<compile_context>
chip_gen: v5e
topology: v5e:2x2
jax: 0.10.0
libtpu: 0.0.40
codegen_flags: <defaults>
</compile_context>

<pallas_src>
import jax
import jax.numpy as jnp
from jax.experimental import pallas as pl
from jax.experimental.pallas import tpu as pltpu

_NEG_BIG = -1e9  # masks padded softmax lanes: exp(-1e9 - m) == 0


def _round_up(x, m):
    return ((x + m - 1) // m) * m


def attention_kernel(q_ref, k_ref, v_ref, w1q_ref, w1k_ref, w2q_ref, w2v_ref, out_ref):
    # q_ref: (TB, Qp) bf16 (ones column at index Q folds b2)
    # k_ref: (TB, Kp) bf16 (ones column at index K folds b1)
    # v_ref: (V1p, V2p) bf16
    # w1q_ref: (Qp, V1p)  w1k_ref: (Kp, V1p)  w2q_ref: (Qp, Op)  w2v_ref: (V2p, Op)
    q = q_ref[...]
    k = k_ref[...]

    # logits = [q | k] @ W1^T + b1  (concat-free split matmul; bias folded into W1_k)
    logits = jnp.dot(q, w1q_ref[...], preferred_element_type=jnp.float32)
    logits = logits + jnp.dot(k, w1k_ref[...], preferred_element_type=jnp.float32)

    # numerically-stable softmax over V1 (padded lanes hold -1e9 -> contribute 0)
    m = jnp.max(logits, axis=1, keepdims=True)
    e = jnp.exp(logits - m)
    attn_w = e * pl.reciprocal(jnp.sum(e, axis=1, keepdims=True), approx=True)

    # attn_applied = attn_w @ value[0]
    applied = jnp.dot(attn_w.astype(v_ref.dtype), v_ref[...],
                      preferred_element_type=jnp.float32)                     # (TB, V2p)

    # output = [q | applied] @ W2^T + b2  (bias folded into W2_q via q's ones column)
    out = jnp.dot(q, w2q_ref[...], preferred_element_type=jnp.float32)
    out = out + jnp.dot(applied.astype(w2v_ref.dtype), w2v_ref[...],
                        preferred_element_type=jnp.float32)                   # (TB, Op)

    out_ref[...] = out.astype(out_ref.dtype)


def attention_forward(query, key, value, params, *, tb_max=512, mxu_dtype=jnp.bfloat16):
    """query: (1,B,Q)  key: (1,B,K)  value: (1,V1,V2)  ->  (1,B,O)"""
    q2 = query[0]      # (B, Q)
    k2 = key[0]        # (B, K)
    v2 = value[0]      # (V1, V2)

    B, Q = q2.shape
    K = k2.shape[1]
    V1, V2 = v2.shape
    O = params["comb_w"].shape[0]

    # Lane-padded sizes; Q/K get one spare slot (the bias "ones" column).
    Qp = _round_up(Q + 1, 128)
    Kp = _round_up(K + 1, 128)
    V1p = _round_up(V1, 128)
    V2p = _round_up(V2, 128)
    Op = _round_up(O, 128)

    # Batch tiling: pad to sublane multiple, tile with a parallel grid axis.
    B8 = _round_up(B, 8)
    TB = min(B8, tb_max)
    GB = pl.cdiv(B8, TB)
    Bp = GB * TB

    f32 = jnp.float32

    def pad2(x, r, c):
        return jnp.pad(x, ((0, r - x.shape[0]), (0, c - x.shape[1])))

    # Activations: zero-pad, then write the ones column used to fold biases.
    q_pad = pad2(q2.astype(f32), Bp, Qp).at[:, Q].set(1.0).astype(mxu_dtype)
    k_pad = pad2(k2.astype(f32), Bp, Kp).at[:, K].set(1.0).astype(mxu_dtype)
    v_pad = pad2(v2.astype(f32), V1p, V2p).astype(mxu_dtype)

    # Split + pre-transpose weights (nn.Linear stores (out, in)).
    W1 = params["attn_w"]      # (V1, Q+K)
    b1 = params["attn_b"]      # (V1,)
    W2 = params["comb_w"]      # (O, Q+V2)
    b2 = params["comb_b"]      # (O,)

    w1q = pad2(W1[:, :Q].T, Qp, V1p)                         # (Qp, V1p)
    w1k = pad2(W1[:, Q:].T, Kp, V1p)                         # (Kp, V1p)
    b1_row = jnp.concatenate([b1, jnp.full((V1p - V1,), _NEG_BIG, f32)])
    w1k = w1k.at[K, :].set(b1_row)                           # b1 + softmax-pad mask

    w2q = pad2(W2[:, :Q].T, Qp, Op)                          # (Qp, Op)
    w2v = pad2(W2[:, Q:].T, V2p, Op)                         # (V2p, Op)
    b2_row = jnp.concatenate([b2, jnp.zeros((Op - O,), f32)])
    w2q = w2q.at[Q, :].set(b2_row)                           # b2 fold

    w1q = w1q.astype(mxu_dtype)
    w1k = w1k.astype(mxu_dtype)
    w2q = w2q.astype(mxu_dtype)
    w2v = w2v.astype(mxu_dtype)

    def row_spec(shape):   # blocked along B, one tile per grid step
        return pl.BlockSpec(shape, lambda i: (i, 0))

    def fix_spec(shape):   # VMEM-resident across all grid steps
        return pl.BlockSpec(shape, lambda i: (0, 0))

    out_pad = pl.pallas_call(
        attention_kernel,
        out_shape=jax.ShapeDtypeStruct((Bp, Op), jnp.float32),
        grid=(GB,),
        in_specs=[
            row_spec((TB, Qp)),
            row_spec((TB, Kp)),
            fix_spec((V1p, V2p)),
            fix_spec((Qp, V1p)),
            fix_spec((Kp, V1p)),
            fix_spec((Qp, Op)),
            fix_spec((V2p, Op)),
        ],
        out_specs=row_spec((TB, Op)),
        compiler_params=pltpu.CompilerParams(
            dimension_semantics=("parallel",)),
    )(q_pad, k_pad, v_pad, w1q, w1k, w2q, w2v)

    return out_pad[:B, :O][None, :, :]   # strip padding, unsqueeze(0)


def init_params(key, query_size, key_size, value_size1, value_size2, output_size):
    """Deterministic init matching nn.Linear shapes: weight (out, in), bias (out,)."""
    k1, k2, k3, k4 = jax.random.split(key, 4)
    in1 = query_size + key_size
    in2 = query_size + value_size2
    s1 = 1.0 / jnp.sqrt(in1)
    s2 = 1.0 / jnp.sqrt(in2)
    return {
        "attn_w": jax.random.uniform(k1, (value_size1, in1), jnp.float32, -s1, s1),
        "attn_b": jax.random.uniform(k2, (value_size1,), jnp.float32, -s1, s1),
        "comb_w": jax.random.uniform(k3, (output_size, in2), jnp.float32, -s2, s2),
        "comb_b": jax.random.uniform(k4, (output_size,), jnp.float32, -s2, s2),
    }


def attention_ref(query, key, value, params):
    """Pure-JAX fp32 reference mirroring the PyTorch forward."""
    qk = jnp.concatenate([query[0], key[0]], axis=1)
    logits = qk @ params["attn_w"].T + params["attn_b"]
    attn_w = jax.nn.softmax(logits, axis=1)
    applied = attn_w @ value[0]
    comb = jnp.concatenate([query[0], applied], axis=1)
    out = comb @ params["comb_w"].T + params["comb_b"]
    return out[None]


if __name__ == "__main__":
    # Small, forward-consistent shapes.
    B = 4
    query_size = 32
    key_size = 32
    value_size1 = 16
    value_size2 = 32
    output_size = 32

    root = jax.random.PRNGKey(0)
    kq, kk, kv, kp = jax.random.split(root, 4)

    query = jax.random.normal(kq, (1, B, query_size), jnp.float32)
    key = jax.random.normal(kk, (1, B, key_size), jnp.float32)
    value = jax.random.normal(kv, (1, value_size1, value_size2), jnp.float32)

    params = init_params(kp, query_size, key_size, value_size1, value_size2, output_size)

    out = attention_forward(query, key, value, params)
    out = jax.block_until_ready(out)

    ref = attention_ref(query, key, value, params)
    assert out.shape == (1, B, output_size), out.shape
    # bf16 MXU operands + approx reciprocal -> compare against fp32 ref with a
    # correspondingly looser tolerance.
    assert jnp.allclose(out, ref, atol=5e-2, rtol=5e-2), "mismatch vs reference"

    print("KERNEL_OK")
</pallas_src>

<mosaic_0001>
module attributes {stable_mosaic.version = 11 : i64} {
  func.func @attention_kernel(%arg0: i32, %arg1: memref<8x128xbf16, #tpu.memory_space<vmem>>, %arg2: memref<8x128xbf16, #tpu.memory_space<vmem>>, %arg3: memref<128x128xbf16, #tpu.memory_space<vmem>>, %arg4: memref<128x128xbf16, #tpu.memory_space<vmem>>, %arg5: memref<128x128xbf16, #tpu.memory_space<vmem>>, %arg6: memref<128x128xbf16, #tpu.memory_space<vmem>>, %arg7: memref<128x128xbf16, #tpu.memory_space<vmem>>, %arg8: memref<8x128xf32, #tpu.memory_space<vmem>>) attributes {dimension_semantics = [#tpu.dimension_semantics<parallel>], iteration_bounds = array<i64: 1>, scalar_prefetch = 0 : i64, scratch_operands = 0 : i64, tpu.core_type = #tpu.core_type<tc>, window_params = [{transform_indices = @transform_0, window_bounds = array<i64: 8, 128>}, {transform_indices = @transform_1, window_bounds = array<i64: 8, 128>}, {pipeline_mode = #tpu.pipeline_mode<synchronous>, transform_indices = @transform_2, window_bounds = array<i64: 128, 128>}, {pipeline_mode = #tpu.pipeline_mode<synchronous>, transform_indices = @transform_3, window_bounds = array<i64: 128, 128>}, {pipeline_mode = #tpu.pipeline_mode<synchronous>, transform_indices = @transform_4, window_bounds = array<i64: 128, 128>}, {pipeline_mode = #tpu.pipeline_mode<synchronous>, transform_indices = @transform_5, window_bounds = array<i64: 128, 128>}, {pipeline_mode = #tpu.pipeline_mode<synchronous>, transform_indices = @transform_6, window_bounds = array<i64: 128, 128>}, {transform_indices = @transform_7, window_bounds = array<i64: 8, 128>}]} {
    %c0 = arith.constant 0 : index
    %c0_0 = arith.constant 0 : index
    %0 = vector.load %arg1[%c0, %c0_0] : memref<8x128xbf16, #tpu.memory_space<vmem>>, vector<8x128xbf16>
    %c0_1 = arith.constant 0 : index
    %c0_2 = arith.constant 0 : index
    %1 = vector.load %arg2[%c0_1, %c0_2] : memref<8x128xbf16, #tpu.memory_space<vmem>>, vector<8x128xbf16>
    %c0_3 = arith.constant 0 : index
    %c0_4 = arith.constant 0 : index
    %2 = vector.load %arg4[%c0_3, %c0_4] : memref<128x128xbf16, #tpu.memory_space<vmem>>, vector<128x128xbf16>
    %cst = arith.constant dense<0.000000e+00> : vector<8x128xf32>
    %3 = tpu.matmul %0, %2, %cst {dimension_numbers = #tpu.dot_dimension_numbers<[1], [0], [0], [1], [0, 0, 1, 1], [], []>} : vector<8x128xbf16>, vector<128x128xbf16>, vector<8x128xf32> -> vector<8x128xf32>
    %c0_5 = arith.constant 0 : index
    %c0_6 = arith.constant 0 : index
    %4 = vector.load %arg5[%c0_5, %c0_6] : memref<128x128xbf16, #tpu.memory_space<vmem>>, vector<128x128xbf16>
    %cst_7 = arith.constant dense<0.000000e+00> : vector<8x128xf32>
    %5 = tpu.matmul %1, %4, %cst_7 {dimension_numbers = #tpu.dot_dimension_numbers<[1], [0], [0], [1], [0, 0, 1, 1], [], []>} : vector<8x128xbf16>, vector<128x128xbf16>, vector<8x128xf32> -> vector<8x128xf32>
    %6 = arith.addf %3, %5 : vector<8x128xf32>
    %cst_8 = arith.constant dense<0xFF800000> : vector<8xf32>
    %7 = vector.multi_reduction <maximumf>, %6, %cst_8 [1] : vector<8x128xf32> to vector<8xf32>
    %8 = vector.shape_cast %7 : vector<8xf32> to vector<8x1xf32>
    %9 = vector.broadcast %8 : vector<8x1xf32> to vector<8x128xf32>
    %10 = arith.subf %6, %9 : vector<8x128xf32>
    %11 = math.exp %10 : vector<8x128xf32>
    %cst_9 = arith.constant dense<0.000000e+00> : vector<8xf32>
    %12 = vector.multi_reduction <add>, %11, %cst_9 [1] : vector<8x128xf32> to vector<8xf32>
    %13 = vector.shape_cast %12 : vector<8xf32> to vector<8x1xf32>
    %14 = tpu.reciprocal %13 {approx = true} : vector<8x1xf32> -> vector<8x1xf32>
    %15 = vector.broadcast %14 : vector<8x1xf32> to vector<8x128xf32>
    %16 = arith.mulf %11, %15 : vector<8x128xf32>
    %17 = arith.truncf %16 : vector<8x128xf32> to vector<8x128xbf16>
    %c0_10 = arith.constant 0 : index
    %c0_11 = arith.constant 0 : index
    %18 = vector.load %arg3[%c0_10, %c0_11] : memref<128x128xbf16, #tpu.memory_space<vmem>>, vector<128x128xbf16>
    %cst_12 = arith.constant dense<0.000000e+00> : vector<8x128xf32>
    %19 = tpu.matmul %17, %18, %cst_12 {dimension_numbers = #tpu.dot_dimension_numbers<[1], [0], [0], [1], [0, 0, 1, 1], [], []>} : vector<8x128xbf16>, vector<128x128xbf16>, vector<8x128xf32> -> vector<8x128xf32>
    %c0_13 = arith.constant 0 : index
    %c0_14 = arith.constant 0 : index
    %20 = vector.load %arg6[%c0_13, %c0_14] : memref<128x128xbf16, #tpu.memory_space<vmem>>, vector<128x128xbf16>
    %cst_15 = arith.constant dense<0.000000e+00> : vector<8x128xf32>
    %21 = tpu.matmul %0, %20, %cst_15 {dimension_numbers = #tpu.dot_dimension_numbers<[1], [0], [0], [1], [0, 0, 1, 1], [], []>} : vector<8x128xbf16>, vector<128x128xbf16>, vector<8x128xf32> -> vector<8x128xf32>
    %22 = arith.truncf %19 : vector<8x128xf32> to vector<8x128xbf16>
    %c0_16 = arith.constant 0 : index
    %c0_17 = arith.constant 0 : index
    %23 = vector.load %arg7[%c0_16, %c0_17] : memref<128x128xbf16, #tpu.memory_space<vmem>>, vector<128x128xbf16>
    %cst_18 = arith.constant dense<0.000000e+00> : vector<8x128xf32>
    %24 = tpu.matmul %22, %23, %cst_18 {dimension_numbers = #tpu.dot_dimension_numbers<[1], [0], [0], [1], [0, 0, 1, 1], [], []>} : vector<8x128xbf16>, vector<128x128xbf16>, vector<8x128xf32> -> vector<8x128xf32>
    %25 = arith.addf %21, %24 : vector<8x128xf32>
    %c0_19 = arith.constant 0 : index
    %c0_20 = arith.constant 0 : index
    %26 = vector.load %arg8[%c0_19, %c0_20] : memref<8x128xf32, #tpu.memory_space<vmem>>, vector<8x128xf32>
    tpu.vector_store %arg8[%c0_19, %c0_20], %25 {strides = array<i32>} : memref<8x128xf32, #tpu.memory_space<vmem>>, vector<8x128xf32>,
    return
  }
  func.func @transform_0(%arg0: i32) -> (i32, i32) {
    %c0_i32 = arith.constant 0 : i32
    %c0_i32_0 = arith.constant 0 : i32
    return %arg0, %c0_i32 : i32, i32
  }
  func.func @transform_1(%arg0: i32) -> (i32, i32) {
    %c0_i32 = arith.constant 0 : i32
    %c0_i32_0 = arith.constant 0 : i32
    return %arg0, %c0_i32 : i32, i32
  }
  func.func @transform_2(%arg0: i32) -> (i32, i32) {
    %c0_i32 = arith.constant 0 : i32
    %c0_i32_0 = arith.constant 0 : i32
    %c0_i32_1 = arith.constant 0 : i32
    return %c0_i32, %c0_i32_0 : i32, i32
  }
  func.func @transform_3(%arg0: i32) -> (i32, i32) {
    %c0_i32 = arith.constant 0 : i32
    %c0_i32_0 = arith.constant 0 : i32
    %c0_i32_1 = arith.constant 0 : i32
    return %c0_i32, %c0_i32_0 : i32, i32
  }
  func.func @transform_4(%arg0: i32) -> (i32, i32) {
    %c0_i32 = arith.constant 0 : i32
    %c0_i32_0 = arith.constant 0 : i32
    %c0_i32_1 = arith.constant 0 : i32
    return %c0_i32, %c0_i32_0 : i32, i32
  }
  func.func @transform_5(%arg0: i32) -> (i32, i32) {
    %c0_i32 = arith.constant 0 : i32
    %c0_i32_0 = arith.constant 0 : i32
    %c0_i32_1 = arith.constant 0 : i32
    return %c0_i32, %c0_i32_0 : i32, i32
  }
  func.func @transform_6(%arg0: i32) -> (i32, i32) {
    %c0_i32 = arith.constant 0 : i32
    %c0_i32_0 = arith.constant 0 : i32
    %c0_i32_1 = arith.constant 0 : i32
    return %c0_i32, %c0_i32_0 : i32, i32
  }
  func.func @transform_7(%arg0: i32) -> (i32, i32) {
    %c0_i32 = arith.constant 0 : i32
    %c0_i32_0 = arith.constant 0 : i32
    return %arg0, %c0_i32 : i32, i32
  }
}

</mosaic_0001>

<bundles_post_ra>
// kernel: tpu_custom_call.1
= control target key start
LH: loop header
LB: loop body
LE: loop exit
PB: predicated region body
PF: predicated region fallthrough
CT: control target
= control target key end

     0   :  { %12 = vsyncpa [#allocation3], 0  ;;  %s1060_s0 = inlined_call_operand.hbm [shape: bf16[8,128], index: 0, kind: input, shape index: {}]   ;;  %s1061_s1 = inlined_call_operand.hbm [shape: bf16[8,128], index: 1, kind: input, shape index: {}]   ;;  %s1062_s2 = inlined_call_operand.hbm [shape: bf16[128,128], index: 2, kind: input, shape index: {}]   ;;  %s1063_s3 = inlined_call_operand.hbm [shape: bf16[128,128], index: 3, kind: input, shape index: {}]   ;;  %s1064_s4 = inlined_call_operand.hbm [shape: bf16[128,128], index: 4, kind: input, shape index: {}]   ;;  %s1065_s5 = inlined_call_operand.hbm [shape: bf16[128,128], index: 5, kind: input, shape index: {}]   ;;  %s1066_s6 = inlined_call_operand.hbm [shape: bf16[128,128], index: 6, kind: input, shape index: {}]   ;;  %s1067_s7 = inlined_call_operand.hbm [shape: f32[8,128], index: 7, kind: output, shape index: {}]  }
   0x1   :  { %13 = vsyncpa [#allocation6], 0 }
   0x2   :  { %14 = vsyncpa [#allocation9], 0 }
   0x3   :  { %15 = vsyncpa [#allocation12], 0  ;;  %s33_s26 = sshll.u32 %s1061_s1, 4  ;;  %s34_s26 = int_to_ptr.hbm [resolvable:$true] %s33_s26 }
   0x4   :  { %16 = vsyncpa [#allocation4], 0  ;;  %s967_s27 = smov [#allocation5]   ;;  %s56_s8 = sshll.u32 %s1063_s3, 4  ;;  %s57_s8 = int_to_ptr.hbm [resolvable:$true] %s56_s8 }
   0x5   :  { %s35_s28 = sshll.u32 %s967_s27, 4  ;;  %s968_s9 = smov [#allocation8]   ;;  %s36_s28 = int_to_ptr.vmem [resolvable:$true] %s35_s28 }
   0x6   :  { %38 = dma.hbm_to_vmem [thread:$0]  %s34_s26, 64, %s36_s28, [#allocation6]  }
   0x7   :  { %s58_s10 = sshll.u32 %s968_s9, 4  ;;  %s82_s13 = sshll.u32 %s1065_s5, 4  ;;  %s59_s10 = int_to_ptr.vmem [resolvable:$true] %s58_s10  ;;  %s83_s13 = int_to_ptr.hbm [resolvable:$true] %s82_s13 }
   0x8   :  { %s969_s1 = smov 64   ;;  %s970_s14 = smov 4  }
   0x9   :  { %64 = dma.hbm_to_vmem [thread:$0]  %s57_s8, 1024, %s59_s10, [#allocation9], %s969_s1, %s969_s1, %s970_s14  }
   0xa   :  { %s22_s17 = sshll.u32 %s1060_s0, 4  ;;  %s971_s3 = smov [#allocation11]   ;;  %s23_s17 = int_to_ptr.hbm [resolvable:$true] %s22_s17 }
   0xb   :  { %s84_s18 = sshll.u32 %s971_s3, 4  ;;  %s972_s5 = smov [#allocation2]   ;;  %s85_s18 = int_to_ptr.vmem [resolvable:$true] %s84_s18 }
   0xc   :  { %90 = dma.hbm_to_vmem [thread:$0]  %s83_s13, 1024, %s85_s18, [#allocation12], %s969_s1, %s969_s1, %s970_s14  }
   0xd   :  { %s24_s19 = sshll.u32 %s972_s5, 4  ;;  %s43_s22 = sshll.u32 %s1062_s2, 4  ;;  %s25_s19 = int_to_ptr.vmem [resolvable:$true] %s24_s19  ;;  %s44_s22 = int_to_ptr.hbm [resolvable:$true] %s43_s22 }
   0xe   :  { %27 = dma.hbm_to_vmem [thread:$0]  %s23_s17, 64, %s25_s19, [#allocation3]  }
   0xf   :  { %s69_s0 = sshll.u32 %s1064_s4, 4  ;;  %s973_s25 = smov [#allocation7]   ;;  %s70_s0 = int_to_ptr.hbm [resolvable:$true] %s69_s0 }
  0x10   :  { %s45_s26 = sshll.u32 %s973_s25, 4  ;;  %s974_s27 = smov [#allocation10]   ;;  %s46_s26 = int_to_ptr.vmem [resolvable:$true] %s45_s26 }
  0x11   :  { %51 = dma.hbm_to_vmem [thread:$0]  %s44_s22, 1024, %s46_s26, [#allocation6], %s969_s1, %s969_s1, %s970_s14  }
  0x12   :  { %s71_s28 = sshll.u32 %s974_s27, 4  ;;  %s95_s2 = sshll.u32 %s1066_s6, 4  ;;  %s72_s28 = int_to_ptr.vmem [resolvable:$true] %s71_s28  ;;  %s96_s2 = int_to_ptr.hbm [resolvable:$true] %s95_s2 }
  0x13   :  { %77 = dma.hbm_to_vmem [thread:$0]  %s70_s0, 1024, %s72_s28, [#allocation9], %s969_s1, %s969_s1, %s970_s14  }
  0x14   :  { %s975_s4 = smov [#allocation13]  }
  0x15   :  { %s97_s8 = sshll.u32 %s975_s4, 4  ;;  %s98_s8 = int_to_ptr.vmem [resolvable:$true] %s97_s8 }
  0x16   :  { %103 = dma.hbm_to_vmem [thread:$0]  %s96_s2, 1024, %s98_s8, [#allocation12], %s969_s1, %s969_s1, %s970_s14  }
  0x17   :  { %957 = dma.done.wait [#allocation3], 64  }
  0x18   :  { %958 = vsyncadd [#allocation3], 4294967232 }
  0x19   :  { %959 = dma.done.wait [#allocation6], 1088  }
  0x1a   :  { %960 = vsyncadd [#allocation6], 4294966208 }
  0x1b   :  { %961 = dma.done.wait [#allocation9], 2048  }
  0x1c   :  { %962 = vsyncadd [#allocation9], 4294965248 }
  0x1d   :  { %963 = dma.done.wait [#allocation12], 2048  }
  0x1e   :  { %964 = vsyncadd [#allocation12], 4294965248  ;;  %v726_v0 = vld [vmem:[#allocation10 + $0x38] sm:$0xff]  ;;  %v725_v2 = vld [vmem:[#allocation10 + $0x30] sm:$0xff]  ;;  %s976_s6 = smov [#allocation14]   ;;  %s538_s12 = sshll.u32 %s1067_s7, 4  ;;  %s539_s12 = int_to_ptr.hbm [resolvable:$true] %s538_s12 }
  0x1f   :  { %v718_v1 = vld [vmem:[#allocation8 + $0x38] sm:$0xff]  ;;  %214 = vmatpush.bf16.msra.mxu0 %v726_v0  ;;  %v717_v3 = vld [vmem:[#allocation8 + $0x30] sm:$0xff]  ;;  %v724_v4 = vld [vmem:[#allocation10 + $0x28] sm:$0xff]  ;;  %s536_s9 = sshll.u32 %s976_s6, 4  ;;  %s537_s9 = int_to_ptr.vmem [resolvable:$true] %s536_s9 }
  0x20   :  { %275 = vmatpush.bf16.msra.mxu1 %v718_v1  ;;  %v716_v5 = vld [vmem:[#allocation8 + $0x28] sm:$0xff]  ;;  %v723_v6 = vld [vmem:[#allocation10 + $0x20] sm:$0xff]  ;;  %v722_v8 = vld [vmem:[#allocation10 + $0x18] sm:$0xff] }
  0x21   :  { %v715_v7 = vld [vmem:[#allocation8 + $0x20] sm:$0xff]  ;;  %v714_v9 = vld [vmem:[#allocation8 + $0x18] sm:$0xff]  ;;  %v721_v10 = vld [vmem:[#allocation10 + $0x10] sm:$0xff] }
  0x22   :  { %v713_v11 = vld [vmem:[#allocation8 + $0x10] sm:$0xff]  ;;  %v720_v12 = vld [vmem:[#allocation10 + $0x8] sm:$0xff]  ;;  %v719_v14 = vld [vmem:[#allocation10] sm:$0xff] }
  0x23   :  { %215 = vmatpush.bf16.msra.mxu0 %v725_v2  ;;  %v712_v13 = vld [vmem:[#allocation8 + $0x8] sm:$0xff]  ;;  %v711_v15 = vld [vmem:[#allocation8] sm:$0xff]  ;;  %v133_v16 = vld [vmem:[#allocation5] sm:$0xf] }
  0x24   :  { %276 = vmatpush.bf16.msra.mxu1 %v717_v3  ;;  %v1053_v17 = vld [vmem:[#allocation2] sm:$0xf]  ;;  %v733_v24 = vld [vmem:[#allocation7 + $0x30] sm:$0xff]  ;;  %v732_v25 = vld [vmem:[#allocation7 + $0x28] sm:$0xff] }
  0x25   :  { %v734_v23 = vld [vmem:[#allocation7 + $0x38] sm:$0xff]  ;;  %v731_v26 = vld [vmem:[#allocation7 + $0x20] sm:$0xff]  ;;  %v729_v32 = vld [vmem:[#allocation7 + $0x10] sm:$0xff] }
  0x26   :  { %362 = vmatpush.bf16.msra.mxu2 %v734_v23  ;;  %v730_v27 = vld [vmem:[#allocation7 + $0x18] sm:$0xff]  ;;  %v728_v33 = vld [vmem:[#allocation7 + $0x8] sm:$0xff]  ;;  %v727_v34 = vld [vmem:[#allocation7] sm:$0xff] }
  0x27   :  { %216 = vmatpush.bf16.msra.mxu0 %v724_v4  ;;  %v742_v35 = vld [vmem:[#allocation11 + $0x38] sm:$0xff]  ;;  %v741_v37 = vld [vmem:[#allocation11 + $0x30] sm:$0xff]  ;;  %v740_v39 = vld [vmem:[#allocation11 + $0x28] sm:$0xff] }
  0x28   :  { %277 = vmatpush.bf16.msra.mxu1 %v716_v5  ;;  %v750_v36 = vld [vmem:[#allocation13 + $0x38] sm:$0xff]  ;;  %v749_v38 = vld [vmem:[#allocation13 + $0x30] sm:$0xff]  ;;  %v748_v40 = vld [vmem:[#allocation13 + $0x28] sm:$0xff] }
  0x29   :  { %456 = vmatpush.bf16.msra.mxu3 %v750_v36  ;;  %v739_v41 = vld [vmem:[#allocation11 + $0x20] sm:$0xff]  ;;  %v738_v43 = vld [vmem:[#allocation11 + $0x18] sm:$0xff]  ;;  %v737_v45 = vld [vmem:[#allocation11 + $0x10] sm:$0xff] }
  0x2a   :  { %363 = vmatpush.bf16.msra.mxu2 %v733_v24  ;;  %v747_v42 = vld [vmem:[#allocation13 + $0x20] sm:$0xff]  ;;  %v746_v44 = vld [vmem:[#allocation13 + $0x18] sm:$0xff]  ;;  %v745_v46 = vld [vmem:[#allocation13 + $0x10] sm:$0xff] }
  0x2b   :  { %217 = vmatpush.bf16.msra.mxu0 %v723_v6  ;;  %v736_v48 = vld [vmem:[#allocation11 + $0x8] sm:$0xff]  ;;  %v735_v50 = vld [vmem:[#allocation11] sm:$0xff] }
  0x2c   :  { %278 = vmatpush.bf16.msra.mxu1 %v715_v7  ;;  %v744_v49 = vld [vmem:[#allocation13 + $0x8] sm:$0xff]  ;;  %v743_v54 = vld [vmem:[#allocation13] sm:$0xff] }
  0x2d   :  { %457 = vmatpush.bf16.msra.mxu3 %v749_v38 }
  0x2e   :  { %364 = vmatpush.bf16.msra.mxu2 %v732_v25 }
  0x2f   :  { %218 = vmatpush.bf16.msra.mxu0 %v722_v8 }
  0x30   :  { %279 = vmatpush.bf16.msra.mxu1 %v714_v9 }
  0x31   :  { %458 = vmatpush.bf16.msra.mxu3 %v748_v40 }
  0x32   :  { %365 = vmatpush.bf16.msra.mxu2 %v731_v26 }
  0x33   :  { %219 = vmatpush.bf16.msra.mxu0 %v721_v10 }
  0x34   :  { %280 = vmatpush.bf16.msra.mxu1 %v713_v11 }
  0x35   :  { %459 = vmatpush.bf16.msra.mxu3 %v747_v42 }
  0x36   :  { %366 = vmatpush.bf16.msra.mxu2 %v730_v27 }
  0x37   :  { %220 = vmatpush.bf16.msra.mxu0 %v720_v12 }
  0x38   :  { %281 = vmatpush.bf16.msra.mxu1 %v712_v13 }
  0x39   :  { %460 = vmatpush.bf16.msra.mxu3 %v746_v44 }
  0x3a   :  { %367 = vmatpush.bf16.msra.mxu2 %v729_v32 }
  0x3b   :  { %221 = vmatpush.bf16.msra.mxu0 %v719_v14 }
  0x3c   :  { %282 = vmatpush.bf16.msra.mxu1 %v711_v15 }
  0x3d   :  { %461 = vmatpush.bf16.msra.mxu3 %v745_v46 }
  0x3e   :  { %222 = vmatmul.bf16.vlgmr.msra.gmra.mxu0 %v133_v16  ;;  %368 = vmatpush.bf16.msra.mxu2 %v728_v33 }
  0x3f   :  { %283 = vmatmul.bf16.vlgmr.msra.gmra.mxu1 %v1053_v17  ;;  %517 = vmatpush.bf16.msrb.mxu0 %v742_v35 }
  0x41   :  { %462 = vmatpush.bf16.msra.mxu3 %v744_v49 }
  0x42   :  { %369 = vmatpush.bf16.msra.mxu2 %v727_v34 }
  0x43   :  { %518 = vmatpush.bf16.msrb.mxu0 %v741_v37 }
  0x45   :  { %463 = vmatpush.bf16.msra.mxu3 %v743_v54 }
  0x47   :  { %519 = vmatpush.bf16.msrb.mxu0 %v740_v39 }
  0x4b   :  { %520 = vmatpush.bf16.msrb.mxu0 %v739_v41 }
  0x4f   :  { %521 = vmatpush.bf16.msrb.mxu0 %v738_v43 }
  0x53   :  { %522 = vmatpush.bf16.msrb.mxu0 %v737_v45 }
  0x57   :  { %523 = vmatpush.bf16.msrb.mxu0 %v736_v48 }
  0x5b   :  { %524 = vmatpush.bf16.msrb.mxu0 %v735_v50 }
  0x5e   :  { %525 = vmatmul.bf16.vlgmr.msrb.gmra.mxu0 %v1053_v17 }
  0xbb   :  { %v223_v18 = vpop.f32.mrf.mxu0 }
  0xbc   :  { %v284_v19 = vpop.f32.mrf.mxu1 }
  0xbd   :  { %v285_v20 = vadd.f32 %v284_v19, %v223_v18 }
  0xbf   :  { %288 = vmax.xlane.f32.xlu0 %v285_v20 }
  0xc3   :  { %v225_v21 = vpop.f32.mrf.mxu0 }
  0xc4   :  { %v286_v22 = vpop.f32.mrf.mxu1 }
  0xdb   :  { %v526_v55 = vpop.f32.mrf.mxu0 }
  0xe3   :  { %v528_v58 = vpop.f32.mrf.mxu0 }
 0x132   :  { %v289_v28 = vpop.xlane.xlu0 %288 }
 0x133   :  { %v290_v29 = vsub.f32 %v285_v20, %v289_v28 }
 0x135   :  { %v291_v30 = vmul.f32 1.442695, %v290_v29 }
 0x137   :  { %761 = vpow2.f32 %v291_v30 }
 0x13d   :  { %v762_v31 = vpop.eup %761 }
 0x13e   :  { %293 = vadd.xlane.f32.xlu0 %v762_v31 }
 0x1b1   :  { %v294_v47 = vpop.xlane.xlu0 %293 }
 0x1b2   :  { %763 = vrcp.f32 %v294_v47 }
 0x1b8   :  { %v764_v51 = vpop.eup %763 }
 0x1b9   :  { %v296_v52 = vmul.f32 %v764_v51, %v762_v31 }
 0x1bb   :  { %v297_v53 = vpack.c.bf16 %v296_v52, %v296_v52 }
 0x1bd   :  { %370 = vmatmul.bf16.vlgmr.msra.gmra.mxu2 %v297_v53 }
 0x240   :  { %v371_v56 = vpop.f32.mrf.mxu2 }
 0x241   :  { %v391_v57 = vpack.c.bf16 %v371_v56, %v371_v56 }
 0x243   :  { %464 = vmatmul.bf16.vlgmr.msra.gmra.mxu3 %v391_v57 }
 0x248   :  { %v373_v59 = vpop.f32.mrf.mxu2 }
 0x2c6   :  { %v465_v60 = vpop.f32.mrf.mxu3 }
 0x2c7   :  { %v527_v61 = vadd.f32 %v526_v55, %v465_v60 }
 0x2c9   :  { %530 = vst [vmem:[#allocation14] sm:$0xff] %v527_v61 }
 0x2ca   :  { %541 = dma.vmem_to_hbm [thread:$0]  %s537_s9, 128, %s539_s12, [#allocation4]  }
 0x2ce   :  { %v467_v62 = vpop.f32.mrf.mxu3 }
 0x2cf   :  { %965 = dma.done.wait [#allocation4], 128  }
 0x2d0   :  { %966 = vsyncadd [#allocation4], 4294967168 }
 0x2d1   :  { %546 = vsyncpa [#allocation3], 1 }
 0x2d2   :  { %547 = vsyncpa [#allocation6], 1 }
 0x2d3   :  { %548 = vsyncpa [#allocation9], 1 }
 0x2d4   :  { %549 = vsyncpa [#allocation12], 1 }
 0x2d5   :  { %550 = vsyncpa [#allocation4], 1 }

</bundles_post_ra>
